<compile_context>
chip_gen: v6e
topology: v6e:2x2x1
jax: 0.10.0
libtpu: 0.0.40
codegen_flags: <defaults>
</compile_context>

<pallas_src>
from math import log

import jax
import jax.numpy as jnp
from jax.experimental import pallas as pl
from jax.experimental.pallas import tpu as pltpu


# Tables at or below this size take the VMEM-resident fast path.
_VMEM_TABLE_BYTES_LIMIT = 4 * 1024 * 1024

_ROW_TILES = (256, 128, 64, 32, 16, 8)


def _pick_row_tile(n):
    """Largest power-of-two row tile (8..256) dividing n.

    If the resulting grid is odd (and > 1) the tile is halved once so the
    "parallel" grid axis splits evenly across v7x's two TensorCores; on
    single-TC chips (v5e/v6e) that costs at most one extra ~0.35us grid step.
    Returns None when no power-of-two tile divides n (caller pads).
    """
    for tm in _ROW_TILES:
        if n % tm == 0:
            g = n // tm
            if g > 1 and g % 2 == 1 and tm >= 16:
                tm //= 2
            return tm
    return None


def _is_concrete(x):
    try:
        return not isinstance(x, jax.core.Tracer)
    except Exception:
        return False


# ----------------------------------------------------------------------------
# Kernel 1a: embedding lookup for large tables -- manual HBM row-gather DMA.
#   tok_ref   : [N_pad]  int32       scalar-prefetch operand (SMEM)
#   table_ref : [V, D]   table dtype raw HBM ref (memory_space=pl.ANY)
#   out_ref   : [TM, D]  table dtype pipelined output tile (VMEM)
#   sem       : scalar DMA semaphore (byte-counting; shared by all row copies)
# ----------------------------------------------------------------------------
def _embed_gather_hbm_kernel(tok_ref, table_ref, out_ref, sem):
    i = pl.program_id(0)
    tm = out_ref.shape[0]
    base = i * tm
    # Issue all TM row gathers straight into the pipelined output block (no
    # VMEM staging copy).  Pallas's output double-buffering overlaps tile
    # i-1's HBM writeback with these gathers.
    for r in range(tm):
        pltpu.make_async_copy(
            table_ref.at[tok_ref[base + r]], out_ref.at[r], sem).start()
    # Wait for all TM copies.  Descriptors are rebuilt with the real row so
    # the waited byte counts always match the started ones.
    for r in range(tm):
        pltpu.make_async_copy(
            table_ref.at[tok_ref[base + r]], out_ref.at[r], sem).wait()


# ----------------------------------------------------------------------------
# Kernel 1b: embedding lookup for small tables -- table streamed into VMEM
# once, rows gathered with dynamic in-VMEM slices (no per-row DMA descriptors).
#   tok_ref   : [N_pad]  int32       scalar-prefetch operand (SMEM)
#   table_ref : [V, D]   table dtype VMEM block (constant index_map)
#   out_ref   : [TM, D]  table dtype pipelined output tile (VMEM)
# ----------------------------------------------------------------------------
def _embed_gather_vmem_kernel(tok_ref, table_ref, out_ref):
    i = pl.program_id(0)
    tm = out_ref.shape[0]
    base = i * tm
    for r in range(tm):
        tok = tok_ref[base + r]
        out_ref[pl.ds(r, 1), :] = table_ref[pl.ds(tok, 1), :]


# ----------------------------------------------------------------------------
# Kernel 2: sinusoidal positional encoding (PositionalEncoding.pe[:S]).
#   pe[p, 2i]   = sin(p * exp(2i * -log(10000)/D))
#   pe[p, 2i+1] = cos(p * exp(2i * -log(10000)/D))
# Tiled over S; out_ref is one [TS, D] tile.
# ----------------------------------------------------------------------------
def _pos_encoding_kernel(out_ref):
    ts, d = out_ref.shape
    base = pl.program_id(0) * ts
    # div_term on a single (1, d) row -> d exp() calls instead of ts*d.
    col = jax.lax.broadcasted_iota(jnp.int32, (1, d), 1)
    half = (col // 2).astype(jnp.float32)
    div_term = jnp.exp(half * (-2.0 * log(10000.0) / d))            # (1, d)
    pos = base + jax.lax.broadcasted_iota(jnp.int32, (ts, 1), 0)    # (ts, 1)
    angle = pos.astype(jnp.float32) * div_term                      # (ts, d)
    out_ref[...] = jnp.where((col % 2) == 0, jnp.sin(angle), jnp.cos(angle))


# Positional encoding is a constant per (S, D): compute once, cache, reuse.
_PE_CACHE = {}


def _positional_encoding(S, D):
    key = (int(S), int(D))
    cached = _PE_CACHE.get(key)
    if cached is not None:
        return cached

    TS = S
    for t in (512, 256, 128, 64, 32, 16, 8):
        if S % t == 0:
            TS = t
            break

    pe = pl.pallas_call(
        _pos_encoding_kernel,
        out_shape=jax.ShapeDtypeStruct((S, D), jnp.float32),
        grid_spec=pltpu.PrefetchScalarGridSpec(
            num_scalar_prefetch=0,
            grid=(S // TS,),
            in_specs=[],
            out_specs=pl.BlockSpec((TS, D), lambda i: (i, 0)),
        ),
        compiler_params=pltpu.CompilerParams(
            dimension_semantics=("parallel",)),
    )()

    if _is_concrete(pe):          # don't cache tracers if called under jit
        _PE_CACHE[key] = pe
    return pe


def token_encoder_forward(tokens, masks, embed_table, use_pos_embed=True,
                          vmem_table_bytes_limit=_VMEM_TABLE_BYTES_LIMIT):
    """tokens: [B, S] int, masks: [B, S] float32, embed_table: [V, D]."""
    B, S = tokens.shape
    V, D = embed_table.shape
    N = B * S
    out_dtype = embed_table.dtype          # native dtype, like nn.Embedding

    TM = _pick_row_tile(N)
    if TM is None:
        TM = 8
        # TODO(synk): no power-of-two row tile divides B*S; the padded output
        # forces an extra O(N*D) tail slice/copy after the kernel.
    N_pad = ((N + TM - 1) // TM) * TM
    grid = (N_pad // TM,)

    # Clamp ids so the gather stays in bounds (PyTorch would raise instead).
    tok_flat = jnp.clip(tokens.reshape(N).astype(jnp.int32), 0, V - 1)
    if N_pad != N:
        tok_flat = jnp.concatenate(
            [tok_flat, jnp.zeros((N_pad - N,), jnp.int32)])

    table_bytes = V * D * jnp.dtype(embed_table.dtype).itemsize
    if table_bytes <= vmem_table_bytes_limit:
        # Small table: stream it into VMEM once, gather with dynamic slices.
        x_flat = pl.pallas_call(
            _embed_gather_vmem_kernel,
            out_shape=jax.ShapeDtypeStruct((N_pad, D), out_dtype),
            grid_spec=pltpu.PrefetchScalarGridSpec(
                num_scalar_prefetch=1,                           # ids -> SMEM
                grid=grid,
                in_specs=[pl.BlockSpec((V, D), lambda i, tok: (0, 0))],
                out_specs=pl.BlockSpec((TM, D), lambda i, tok: (i, 0)),
            ),
            compiler_params=pltpu.CompilerParams(
                dimension_semantics=("parallel",)),
        )(tok_flat, embed_table)
    else:
        # Large table: keep it in HBM and row-gather with manual DMAs
        # (O(N*D) bytes, the architectural floor; no [V, D] VMEM residency).
        x_flat = pl.pallas_call(
            _embed_gather_hbm_kernel,
            out_shape=jax.ShapeDtypeStruct((N_pad, D), out_dtype),
            grid_spec=pltpu.PrefetchScalarGridSpec(
                num_scalar_prefetch=1,                           # ids -> SMEM
                grid=grid,
                in_specs=[pl.BlockSpec(memory_space=pl.ANY)],    # table in HBM
                out_specs=pl.BlockSpec((TM, D), lambda i, tok: (i, 0)),
                scratch_shapes=[pltpu.SemaphoreType.DMA(())],
            ),
            compiler_params=pltpu.CompilerParams(
                dimension_semantics=("parallel",)),
        )(tok_flat, embed_table)

    x = (x_flat if N_pad == N else x_flat[:N]).reshape(B, S, D)

    if use_pos_embed:
        pos_embed = _positional_encoding(S, D)[None, :, :]   # [1, S, D]
    else:
        # Kept at the reference's [B, S, D] shape (a [1, 1, D] broadcastable
        # zero would avoid the HBM write but changes the returned shape).
        pos_embed = jnp.zeros((B, S, D), out_dtype)

    return x, masks, pos_embed


# ----------------------------------------------------------------------------
# Pure-JAX reference for verification.
# ----------------------------------------------------------------------------
def token_encoder_ref(tokens, masks, embed_table, use_pos_embed=True):
    B, S = tokens.shape
    V, D = embed_table.shape
    x = embed_table[tokens]                        # gather, [B, S, D]
    if use_pos_embed:
        position = jnp.arange(S, dtype=jnp.float32)[:, None]
        div_term = jnp.exp(
            jnp.arange(0, D, 2, dtype=jnp.float32) * (-log(10000.0) / D))
        pe = jnp.zeros((S, D), jnp.float32)
        pe = pe.at[:, 0::2].set(jnp.sin(position * div_term))
        pe = pe.at[:, 1::2].set(jnp.cos(position * div_term))
        pos_embed = pe[None, :, :]
    else:
        pos_embed = jnp.zeros_like(x)
    return x, masks, pos_embed


if __name__ == "__main__":
    key = jax.random.PRNGKey(0)
    B, S = 2, 8            # batch, sequence length
    V, D = 32, 32          # vocab_len, model_dim

    k_tok, k_mask, k_emb = jax.random.split(key, 3)
    tokens = jax.random.randint(k_tok, (B, S), 0, V, dtype=jnp.int32)
    masks = (jax.random.uniform(k_mask, (B, S)) > 0.3).astype(jnp.float32)
    # Deterministic "nn.Embedding" weights (N(0,1) init, as in PyTorch default).
    embed_table = jax.random.normal(k_emb, (V, D), dtype=jnp.float32)

    x_ref_, m_ref_, pe_ref_ = token_encoder_ref(tokens, masks, embed_table, True)

    # 1) Small-table fast path (table VMEM-resident, in-VMEM gather).
    x, m, pe = token_encoder_forward(tokens, masks, embed_table, use_pos_embed=True)
    jax.block_until_ready((x, m, pe))
    assert x.shape == (B, S, D) and pe.shape == (1, S, D) and m.shape == (B, S)
    assert jnp.allclose(x, x_ref_, atol=1e-6), "embedding (VMEM path) mismatch"
    assert jnp.allclose(pe, pe_ref_, atol=1e-5), "positional encoding mismatch"
    assert jnp.allclose(m, m_ref_), "mask mismatch"

    # 2) Large-table path (HBM row-gather DMAs straight into the output tile),
    #    forced by setting the VMEM-resident threshold to 0.
    x2, m2, pe2 = token_encoder_forward(
        tokens, masks, embed_table, use_pos_embed=True, vmem_table_bytes_limit=0)
    jax.block_until_ready((x2, m2, pe2))
    assert jnp.allclose(x2, x_ref_, atol=1e-6), "embedding (HBM path) mismatch"
    assert jnp.allclose(pe2, pe_ref_, atol=1e-5)

    # 3) pos_embed=False branch.
    x3, m3, pe3 = token_encoder_forward(tokens, masks, embed_table, use_pos_embed=False)
    jax.block_until_ready((x3, m3, pe3))
    assert pe3.shape == (B, S, D) and bool(jnp.all(pe3 == 0.0))
    assert jnp.allclose(x3, x_ref_, atol=1e-6)

    print("KERNEL_OK")
</pallas_src>

<mosaic_0001>
module attributes {stable_mosaic.version = 11 : i64} {
  func.func @_embed_gather_vmem_kernel(%arg0: i32, %arg1: memref<16xi32, #tpu.memory_space<smem>>, %arg2: memref<32x32xf32, #tpu.memory_space<vmem>>, %arg3: memref<16x32xf32, #tpu.memory_space<vmem>>) attributes {dimension_semantics = [#tpu.dimension_semantics<parallel>], iteration_bounds = array<i64: 1>, scalar_prefetch = 1 : i64, scratch_operands = 0 : i64, tpu.core_type = #tpu.core_type<tc>, window_params = [{pipeline_mode = #tpu.pipeline_mode<synchronous>, transform_indices = @transform_0, window_bounds = array<i64: 32, 32>}, {transform_indices = @transform_1, window_bounds = array<i64: 16, 32>}]} {
    %c16_i32 = arith.constant 16 : i32
    %0 = arith.muli %arg0, %c16_i32 : i32
    %c0_i32 = arith.constant 0 : i32
    %1 = arith.addi %0, %c0_i32 : i32
    %2 = arith.index_cast %1 : i32 to index
    %3 = memref.load %arg1[%2] : memref<16xi32, #tpu.memory_space<smem>>
    %4 = arith.index_cast %3 : i32 to index
    %c0 = arith.constant 0 : index
    %5 = vector.load %arg2[%4, %c0] : memref<32x32xf32, #tpu.memory_space<vmem>>, vector<1x32xf32>
    %c0_0 = arith.constant 0 : index
    %c0_1 = arith.constant 0 : index
    %6 = vector.load %arg3[%c0_0, %c0_1] : memref<16x32xf32, #tpu.memory_space<vmem>>, vector<1x32xf32>
    tpu.vector_store %arg3[%c0_0, %c0_1], %5 {strides = array<i32>} : memref<16x32xf32, #tpu.memory_space<vmem>>, vector<1x32xf32>,
    %c1_i32 = arith.constant 1 : i32
    %7 = arith.addi %0, %c1_i32 : i32
    %8 = arith.index_cast %7 : i32 to index
    %9 = memref.load %arg1[%8] : memref<16xi32, #tpu.memory_space<smem>>
    %10 = arith.index_cast %9 : i32 to index
    %c0_2 = arith.constant 0 : index
    %11 = vector.load %arg2[%10, %c0_2] : memref<32x32xf32, #tpu.memory_space<vmem>>, vector<1x32xf32>
    %c1 = arith.constant 1 : index
    %c0_3 = arith.constant 0 : index
    %12 = vector.load %arg3[%c1, %c0_3] : memref<16x32xf32, #tpu.memory_space<vmem>>, vector<1x32xf32>
    tpu.vector_store %arg3[%c1, %c0_3], %11 {strides = array<i32>} : memref<16x32xf32, #tpu.memory_space<vmem>>, vector<1x32xf32>,
    %c2_i32 = arith.constant 2 : i32
    %13 = arith.addi %0, %c2_i32 : i32
    %14 = arith.index_cast %13 : i32 to index
    %15 = memref.load %arg1[%14] : memref<16xi32, #tpu.memory_space<smem>>
    %16 = arith.index_cast %15 : i32 to index
    %c0_4 = arith.constant 0 : index
    %17 = vector.load %arg2[%16, %c0_4] : memref<32x32xf32, #tpu.memory_space<vmem>>, vector<1x32xf32>
    %c2 = arith.constant 2 : index
    %c0_5 = arith.constant 0 : index
    %18 = vector.load %arg3[%c2, %c0_5] : memref<16x32xf32, #tpu.memory_space<vmem>>, vector<1x32xf32>
    tpu.vector_store %arg3[%c2, %c0_5], %17 {strides = array<i32>} : memref<16x32xf32, #tpu.memory_space<vmem>>, vector<1x32xf32>,
    %c3_i32 = arith.constant 3 : i32
    %19 = arith.addi %0, %c3_i32 : i32
    %20 = arith.index_cast %19 : i32 to index
    %21 = memref.load %arg1[%20] : memref<16xi32, #tpu.memory_space<smem>>
    %22 = arith.index_cast %21 : i32 to index
    %c0_6 = arith.constant 0 : index
    %23 = vector.load %arg2[%22, %c0_6] : memref<32x32xf32, #tpu.memory_space<vmem>>, vector<1x32xf32>
    %c3 = arith.constant 3 : index
    %c0_7 = arith.constant 0 : index
    %24 = vector.load %arg3[%c3, %c0_7] : memref<16x32xf32, #tpu.memory_space<vmem>>, vector<1x32xf32>
    tpu.vector_store %arg3[%c3, %c0_7], %23 {strides = array<i32>} : memref<16x32xf32, #tpu.memory_space<vmem>>, vector<1x32xf32>,
    %c4_i32 = arith.constant 4 : i32
    %25 = arith.addi %0, %c4_i32 : i32
    %26 = arith.index_cast %25 : i32 to index
    %27 = memref.load %arg1[%26] : memref<16xi32, #tpu.memory_space<smem>>
    %28 = arith.index_cast %27 : i32 to index
    %c0_8 = arith.constant 0 : index
    %29 = vector.load %arg2[%28, %c0_8] : memref<32x32xf32, #tpu.memory_space<vmem>>, vector<1x32xf32>
    %c4 = arith.constant 4 : index
    %c0_9 = arith.constant 0 : index
    %30 = vector.load %arg3[%c4, %c0_9] : memref<16x32xf32, #tpu.memory_space<vmem>>, vector<1x32xf32>
    tpu.vector_store %arg3[%c4, %c0_9], %29 {strides = array<i32>} : memref<16x32xf32, #tpu.memory_space<vmem>>, vector<1x32xf32>,
    %c5_i32 = arith.constant 5 : i32
    %31 = arith.addi %0, %c5_i32 : i32
    %32 = arith.index_cast %31 : i32 to index
    %33 = memref.load %arg1[%32] : memref<16xi32, #tpu.memory_space<smem>>
    %34 = arith.index_cast %33 : i32 to index
    %c0_10 = arith.constant 0 : index
    %35 = vector.load %arg2[%34, %c0_10] : memref<32x32xf32, #tpu.memory_space<vmem>>, vector<1x32xf32>
    %c5 = arith.constant 5 : index
    %c0_11 = arith.constant 0 : index
    %36 = vector.load %arg3[%c5, %c0_11] : memref<16x32xf32, #tpu.memory_space<vmem>>, vector<1x32xf32>
    tpu.vector_store %arg3[%c5, %c0_11], %35 {strides = array<i32>} : memref<16x32xf32, #tpu.memory_space<vmem>>, vector<1x32xf32>,
    %c6_i32 = arith.constant 6 : i32
    %37 = arith.addi %0, %c6_i32 : i32
    %38 = arith.index_cast %37 : i32 to index
    %39 = memref.load %arg1[%38] : memref<16xi32, #tpu.memory_space<smem>>
    %40 = arith.index_cast %39 : i32 to index
    %c0_12 = arith.constant 0 : index
    %41 = vector.load %arg2[%40, %c0_12] : memref<32x32xf32, #tpu.memory_space<vmem>>, vector<1x32xf32>
    %c6 = arith.constant 6 : index
    %c0_13 = arith.constant 0 : index
    %42 = vector.load %arg3[%c6, %c0_13] : memref<16x32xf32, #tpu.memory_space<vmem>>, vector<1x32xf32>
    tpu.vector_store %arg3[%c6, %c0_13], %41 {strides = array<i32>} : memref<16x32xf32, #tpu.memory_space<vmem>>, vector<1x32xf32>,
    %c7_i32 = arith.constant 7 : i32
    %43 = arith.addi %0, %c7_i32 : i32
    %44 = arith.index_cast %43 : i32 to index
    %45 = memref.load %arg1[%44] : memref<16xi32, #tpu.memory_space<smem>>
    %46 = arith.index_cast %45 : i32 to index
    %c0_14 = arith.constant 0 : index
    %47 = vector.load %arg2[%46, %c0_14] : memref<32x32xf32, #tpu.memory_space<vmem>>, vector<1x32xf32>
    %c7 = arith.constant 7 : index
    %c0_15 = arith.constant 0 : index
    %48 = vector.load %arg3[%c7, %c0_15] : memref<16x32xf32, #tpu.memory_space<vmem>>, vector<1x32xf32>
    tpu.vector_store %arg3[%c7, %c0_15], %47 {strides = array<i32>} : memref<16x32xf32, #tpu.memory_space<vmem>>, vector<1x32xf32>,
    %c8_i32 = arith.constant 8 : i32
    %49 = arith.addi %0, %c8_i32 : i32
    %50 = arith.index_cast %49 : i32 to index
    %51 = memref.load %arg1[%50] : memref<16xi32, #tpu.memory_space<smem>>
    %52 = arith.index_cast %51 : i32 to index
    %c0_16 = arith.constant 0 : index
    %53 = vector.load %arg2[%52, %c0_16] : memref<32x32xf32, #tpu.memory_space<vmem>>, vector<1x32xf32>
    %c8 = arith.constant 8 : index
    %c0_17 = arith.constant 0 : index
    %54 = vector.load %arg3[%c8, %c0_17] : memref<16x32xf32, #tpu.memory_space<vmem>>, vector<1x32xf32>
    tpu.vector_store %arg3[%c8, %c0_17], %53 {strides = array<i32>} : memref<16x32xf32, #tpu.memory_space<vmem>>, vector<1x32xf32>,
    %c9_i32 = arith.constant 9 : i32
    %55 = arith.addi %0, %c9_i32 : i32
    %56 = arith.index_cast %55 : i32 to index
    %57 = memref.load %arg1[%56] : memref<16xi32, #tpu.memory_space<smem>>
    %58 = arith.index_cast %57 : i32 to index
    %c0_18 = arith.constant 0 : index
    %59 = vector.load %arg2[%58, %c0_18] : memref<32x32xf32, #tpu.memory_space<vmem>>, vector<1x32xf32>
    %c9 = arith.constant 9 : index
    %c0_19 = arith.constant 0 : index
    %60 = vector.load %arg3[%c9, %c0_19] : memref<16x32xf32, #tpu.memory_space<vmem>>, vector<1x32xf32>
    tpu.vector_store %arg3[%c9, %c0_19], %59 {strides = array<i32>} : memref<16x32xf32, #tpu.memory_space<vmem>>, vector<1x32xf32>,
    %c10_i32 = arith.constant 10 : i32
    %61 = arith.addi %0, %c10_i32 : i32
    %62 = arith.index_cast %61 : i32 to index
    %63 = memref.load %arg1[%62] : memref<16xi32, #tpu.memory_space<smem>>
    %64 = arith.index_cast %63 : i32 to index
    %c0_20 = arith.constant 0 : index
    %65 = vector.load %arg2[%64, %c0_20] : memref<32x32xf32, #tpu.memory_space<vmem>>, vector<1x32xf32>
    %c10 = arith.constant 10 : index
    %c0_21 = arith.constant 0 : index
    %66 = vector.load %arg3[%c10, %c0_21] : memref<16x32xf32, #tpu.memory_space<vmem>>, vector<1x32xf32>
    tpu.vector_store %arg3[%c10, %c0_21], %65 {strides = array<i32>} : memref<16x32xf32, #tpu.memory_space<vmem>>, vector<1x32xf32>,
    %c11_i32 = arith.constant 11 : i32
    %67 = arith.addi %0, %c11_i32 : i32
    %68 = arith.index_cast %67 : i32 to index
    %69 = memref.load %arg1[%68] : memref<16xi32, #tpu.memory_space<smem>>
    %70 = arith.index_cast %69 : i32 to index
    %c0_22 = arith.constant 0 : index
    %71 = vector.load %arg2[%70, %c0_22] : memref<32x32xf32, #tpu.memory_space<vmem>>, vector<1x32xf32>
    %c11 = arith.constant 11 : index
    %c0_23 = arith.constant 0 : index
    %72 = vector.load %arg3[%c11, %c0_23] : memref<16x32xf32, #tpu.memory_space<vmem>>, vector<1x32xf32>
    tpu.vector_store %arg3[%c11, %c0_23], %71 {strides = array<i32>} : memref<16x32xf32, #tpu.memory_space<vmem>>, vector<1x32xf32>,
    %c12_i32 = arith.constant 12 : i32
    %73 = arith.addi %0, %c12_i32 : i32
    %74 = arith.index_cast %73 : i32 to index
    %75 = memref.load %arg1[%74] : memref<16xi32, #tpu.memory_space<smem>>
    %76 = arith.index_cast %75 : i32 to index
    %c0_24 = arith.constant 0 : index
    %77 = vector.load %arg2[%76, %c0_24] : memref<32x32xf32, #tpu.memory_space<vmem>>, vector<1x32xf32>
    %c12 = arith.constant 12 : index
    %c0_25 = arith.constant 0 : index
    %78 = vector.load %arg3[%c12, %c0_25] : memref<16x32xf32, #tpu.memory_space<vmem>>, vector<1x32xf32>
    tpu.vector_store %arg3[%c12, %c0_25], %77 {strides = array<i32>} : memref<16x32xf32, #tpu.memory_space<vmem>>, vector<1x32xf32>,
    %c13_i32 = arith.constant 13 : i32
    %79 = arith.addi %0, %c13_i32 : i32
    %80 = arith.index_cast %79 : i32 to index
    %81 = memref.load %arg1[%80] : memref<16xi32, #tpu.memory_space<smem>>
    %82 = arith.index_cast %81 : i32 to index
    %c0_26 = arith.constant 0 : index
    %83 = vector.load %arg2[%82, %c0_26] : memref<32x32xf32, #tpu.memory_space<vmem>>, vector<1x32xf32>
    %c13 = arith.constant 13 : index
    %c0_27 = arith.constant 0 : index
    %84 = vector.load %arg3[%c13, %c0_27] : memref<16x32xf32, #tpu.memory_space<vmem>>, vector<1x32xf32>
    tpu.vector_store %arg3[%c13, %c0_27], %83 {strides = array<i32>} : memref<16x32xf32, #tpu.memory_space<vmem>>, vector<1x32xf32>,
    %c14_i32 = arith.constant 14 : i32
    %85 = arith.addi %0, %c14_i32 : i32
    %86 = arith.index_cast %85 : i32 to index
    %87 = memref.load %arg1[%86] : memref<16xi32, #tpu.memory_space<smem>>
    %88 = arith.index_cast %87 : i32 to index
    %c0_28 = arith.constant 0 : index
    %89 = vector.load %arg2[%88, %c0_28] : memref<32x32xf32, #tpu.memory_space<vmem>>, vector<1x32xf32>
    %c14 = arith.constant 14 : index
    %c0_29 = arith.constant 0 : index
    %90 = vector.load %arg3[%c14, %c0_29] : memref<16x32xf32, #tpu.memory_space<vmem>>, vector<1x32xf32>
    tpu.vector_store %arg3[%c14, %c0_29], %89 {strides = array<i32>} : memref<16x32xf32, #tpu.memory_space<vmem>>, vector<1x32xf32>,
    %c15_i32 = arith.constant 15 : i32
    %91 = arith.addi %0, %c15_i32 : i32
    %92 = arith.index_cast %91 : i32 to index
    %93 = memref.load %arg1[%92] : memref<16xi32, #tpu.memory_space<smem>>
    %94 = arith.index_cast %93 : i32 to index
    %c0_30 = arith.constant 0 : index
    %95 = vector.load %arg2[%94, %c0_30] : memref<32x32xf32, #tpu.memory_space<vmem>>, vector<1x32xf32>
    %c15 = arith.constant 15 : index
    %c0_31 = arith.constant 0 : index
    %96 = vector.load %arg3[%c15, %c0_31] : memref<16x32xf32, #tpu.memory_space<vmem>>, vector<1x32xf32>
    tpu.vector_store %arg3[%c15, %c0_31], %95 {strides = array<i32>} : memref<16x32xf32, #tpu.memory_space<vmem>>, vector<1x32xf32>,
    return
  }
  func.func @transform_0(%arg0: i32, %arg1: memref<16xi32, #tpu.memory_space<smem>>) -> (i32, i32) {
    %c0_i32 = arith.constant 0 : i32
    %c0_i32_0 = arith.constant 0 : i32
    %c0_i32_1 = arith.constant 0 : i32
    return %c0_i32, %c0_i32_0 : i32, i32
  }
  func.func @transform_1(%arg0: i32, %arg1: memref<16xi32, #tpu.memory_space<smem>>) -> (i32, i32) {
    %c0_i32 = arith.constant 0 : i32
    %c0_i32_0 = arith.constant 0 : i32
    return %arg0, %c0_i32 : i32, i32
  }
}

</mosaic_0001>

<bundles_post_ra>
// kernel: tpu_custom_call.1
= control target key start
LH: loop header
LB: loop body
LE: loop exit
PB: predicated region body
PF: predicated region fallthrough
CT: control target
= control target key end

     0   :  { %s216_s9 = smov [#allocation3]   ;;  %s267_s0 = inlined_call_operand.hbm [shape: s32[16], index: 0, kind: input, shape index: {}]   ;;  %s268_s1 = inlined_call_operand.hbm [shape: f32[32,32], index: 1, kind: input, shape index: {}]   ;;  %s269_s2 = inlined_call_operand.hbm [shape: f32[16,32], index: 2, kind: output, shape index: {}]  }
   0x1   :  { %8 = dma.hbm_to_smem %s267_s0, 16, %s216_s9, [#allocation2] }
   0x2   :  { %210 = dma.done.wait [#allocation2], 16 }
   0x3   :  { %211 = vsyncadd [#allocation2], 4294967280 }
   0x4   :  { %10 = sfence }
   0x5   :  { %11 = vsyncpa [#allocation5], 0 }
   0x6   :  { %12 = vsyncpa [#allocation6], 0  ;;  %s217_s12 = smov [#allocation4]  }
   0x7   :  { %s18_s13 = sshll.u32 %s217_s12, 4  ;;  %s19_s13 = int_to_ptr.vmem [resolvable:$true] %s18_s13 }
   0x8   :  { %s178_s14 = scalar_lea.vmem %s19_s13, 512  ;;  %p183_p1 = scmp.lt.s32.totalorder %s19_s13, %s19_s13 }
   0x9   :  { %p179_p0 = scmp.ne.s32.totalorder %s19_s13, %s178_s14  ;;  %p184_p2 = scmp.lt.s32.totalorder %s178_s14, %s178_s14 }
   0xb   :  { %p185_p3 = por %p184_p2, %p183_p1 }
   0xd   :  { %p186_p4 = pnand %p185_p3, %p179_p0 }
   0xf   :  { %189 = shalt.err (!%p186_p4)
}
  0x10   :  { %s218_s15 = smov 128   ;;  %s219_s16 = smov 8  }
  0x11   :  { %24 = dma.hbm_to_vmem [thread:$0]  %s268_s1, 512, %s19_s13, [#allocation5], %s218_s15, %s218_s15, %s219_s16  }
  0x12   :  { %212 = dma.done.wait [#allocation5], 512  }
  0x13   :  { %213 = vsyncadd [#allocation5], 4294966784  ;;  %s29_s18 = sld [smem:[#allocation3]]  ;;  %vm32_vm0 = vcmask 253952  }
  0x14   :  { %s142_s19 = sld [smem:[#allocation3 + $0x1]] }
  0x15   :  { %s143_s20 = sld [smem:[#allocation3 + $0x2]] }
  0x16   :  { %s144_s21 = sld [smem:[#allocation3 + $0x3]] }
  0x17   :  { %s145_s22 = sld [smem:[#allocation3 + $0x4]] }
  0x18   :  { %s146_s23 = sld [smem:[#allocation3 + $0x5]] }
  0x19   :  { %s147_s24 = sld [smem:[#allocation3 + $0x6]]  ;;  %s30_s25 = scalar_lea.vmem [#allocation4], %s29_s18 }
  0x1a   :  { %v31_v0 = vld [vmem:[%s30_s25] sm:$0x1]  ;;  %s148_s26 = sld [smem:[#allocation3 + $0x7]]  ;;  %s36_s27 = scalar_lea.vmem [#allocation4], %s142_s19 }
  0x1b   :  { %33 = vst.msk [vmem:[#allocation7] sm:$0x1] %vm32_vm0, %v31_v0  ;;  %v37_v1 = vld [vmem:[%s36_s27] sm:$0x1]  ;;  %s149_s28 = sld [smem:[#allocation3 + $0x8]]  ;;  %s41_s1 = scalar_lea.vmem [#allocation4], %s143_s20 }
  0x1c   :  { %38 = vst.msk [vmem:[#allocation7 + $0x1] sm:$0x1] %vm32_vm0, %v37_v1  ;;  %v42_v2 = vld [vmem:[%s41_s1] sm:$0x1]  ;;  %s150_s29 = sld [smem:[#allocation3 + $0x9]]  ;;  %s46_s30 = scalar_lea.vmem [#allocation4], %s144_s21 }
  0x1d   :  { %43 = vst.msk [vmem:[#allocation7 + $0x2] sm:$0x1] %vm32_vm0, %v42_v2  ;;  %v47_v3 = vld [vmem:[%s46_s30] sm:$0x1]  ;;  %s151_s3 = sld [smem:[#allocation3 + $0xa]]  ;;  %s51_s4 = scalar_lea.vmem [#allocation4], %s145_s22 }
  0x1e   :  { %48 = vst.msk [vmem:[#allocation7 + $0x3] sm:$0x1] %vm32_vm0, %v47_v3  ;;  %v52_v4 = vld [vmem:[%s51_s4] sm:$0x1]  ;;  %s152_s5 = sld [smem:[#allocation3 + $0xb]]  ;;  %s56_s6 = scalar_lea.vmem [#allocation4], %s146_s23 }
  0x1f   :  { %53 = vst.msk [vmem:[#allocation7 + $0x4] sm:$0x1] %vm32_vm0, %v52_v4  ;;  %v57_v5 = vld [vmem:[%s56_s6] sm:$0x1]  ;;  %s153_s7 = sld [smem:[#allocation3 + $0xc]]  ;;  %s61_s8 = scalar_lea.vmem [#allocation4], %s147_s24 }
  0x20   :  { %58 = vst.msk [vmem:[#allocation7 + $0x5] sm:$0x1] %vm32_vm0, %v57_v5  ;;  %v62_v6 = vld [vmem:[%s61_s8] sm:$0x1]  ;;  %s154_s9 = sld [smem:[#allocation3 + $0xd]]  ;;  %s66_s10 = scalar_lea.vmem [#allocation4], %s148_s26 }
  0x21   :  { %63 = vst.msk [vmem:[#allocation7 + $0x6] sm:$0x1] %vm32_vm0, %v62_v6  ;;  %v67_v7 = vld [vmem:[%s66_s10] sm:$0x1]  ;;  %s155_s11 = sld [smem:[#allocation3 + $0xe]]  ;;  %s71_s12 = scalar_lea.vmem [#allocation4], %s149_s28 }
  0x22   :  { %68 = vst.msk [vmem:[#allocation7 + $0x7] sm:$0x1] %vm32_vm0, %v67_v7  ;;  %v72_v8 = vld [vmem:[%s71_s12] sm:$0x1]  ;;  %s156_s13 = sld [smem:[#allocation3 + $0xf]]  ;;  %s76_s14 = scalar_lea.vmem [#allocation4], %s150_s29 }
  0x23   :  { %73 = vst.msk [vmem:[#allocation7 + $0x8] sm:$0x1] %vm32_vm0, %v72_v8  ;;  %v77_v9 = vld [vmem:[%s76_s14] sm:$0x1]  ;;  %s81_s0 = scalar_lea.vmem [#allocation4], %s151_s3  ;;  %s220_s18 = smov [#allocation7]  }
  0x24   :  { %78 = vst.msk [vmem:[#allocation7 + $0x9] sm:$0x1] %vm32_vm0, %v77_v9  ;;  %v82_v10 = vld [vmem:[%s81_s0] sm:$0x1]  ;;  %s86_s17 = scalar_lea.vmem [#allocation4], %s152_s5  ;;  %s114_s19 = sshll.u32 %s220_s18, 4  ;;  %s115_s19 = int_to_ptr.vmem [resolvable:$true] %s114_s19 }
  0x25   :  { %83 = vst.msk [vmem:[#allocation7 + $0xa] sm:$0x1] %vm32_vm0, %v82_v10  ;;  %v87_v11 = vld [vmem:[%s86_s17] sm:$0x1]  ;;  %s91_s20 = scalar_lea.vmem [#allocation4], %s153_s7  ;;  %s190_s24 = scalar_lea.vmem %s115_s19, 256 }
  0x26   :  { %88 = vst.msk [vmem:[#allocation7 + $0xb] sm:$0x1] %vm32_vm0, %v87_v11  ;;  %v92_v12 = vld [vmem:[%s91_s20] sm:$0x1]  ;;  %s96_s21 = scalar_lea.vmem [#allocation4], %s154_s9  ;;  %p191_p5 = scmp.ne.s32.totalorder %s115_s19, %s190_s24 }
  0x27   :  { %93 = vst.msk [vmem:[#allocation7 + $0xc] sm:$0x1] %vm32_vm0, %v92_v12  ;;  %v97_v13 = vld [vmem:[%s96_s21] sm:$0x1]  ;;  %s101_s22 = scalar_lea.vmem [#allocation4], %s155_s11  ;;  %p195_p6 = scmp.lt.s32.totalorder %s115_s19, %s115_s19 }
  0x28   :  { %98 = vst.msk [vmem:[#allocation7 + $0xd] sm:$0x1] %vm32_vm0, %v97_v13  ;;  %v102_v14 = vld [vmem:[%s101_s22] sm:$0x1]  ;;  %s106_s23 = scalar_lea.vmem [#allocation4], %s156_s13  ;;  %p196_p7 = scmp.lt.s32.totalorder %s190_s24, %s190_s24 }
  0x29   :  { %103 = vst.msk [vmem:[#allocation7 + $0xe] sm:$0x1] %vm32_vm0, %v102_v14  ;;  %v107_v15 = vld [vmem:[%s106_s23] sm:$0x1] }
  0x2a   :  { %108 = vst.msk [vmem:[#allocation7 + $0xf] sm:$0x1] %vm32_vm0, %v107_v15  ;;  %p197_p8 = por %p196_p7, %p195_p6 }
  0x2c   :  { %p198_p9 = pnand %p197_p8, %p191_p5 }
  0x2e   :  { %201 = shalt.err (!%p198_p9)
}
  0x2f   :  { %120 = dma.vmem_to_hbm [thread:$0]  %s115_s19, 256, %s269_s2, [#allocation6], %s218_s15, %s218_s15, %s219_s16  }
  0x30   :  { %214 = dma.done.wait [#allocation6], 256  }
  0x31   :  { %215 = vsyncadd [#allocation6], 4294967040 }
  0x32   :  { %124 = vsyncpa [#allocation5], 1 }
  0x33   :  { %125 = vsyncpa [#allocation6], 1 }

</bundles_post_ra>
